<compile_context>
chip_gen: v7x
topology: tpu7x:2x2x1
jax: 0.10.0
libtpu: 0.0.40
codegen_flags: <defaults>
</compile_context>

<pallas_src>
import jax
import jax.numpy as jnp
from jax.experimental import pallas as pl
from jax.experimental.pallas import tpu as pltpu


def spatial_fc_kernel(x_ref, w_ref, b_ref, o_ref):
    # x_ref: (N, TL)  bf16   lane-fused (batch*feature) columns for this chunk
    # w_ref: (N, N)   bf16   fc weight (out, in) — PyTorch nn.Linear convention
    # b_ref: (N, 1)   f32    fc bias (broadcasts along lanes)
    # o_ref: (N, TL)  out dtype
    y = jnp.dot(w_ref[...], x_ref[...], preferred_element_type=jnp.float32)  # MXU, f32 acc
    o_ref[...] = (y + b_ref[...]).astype(o_ref.dtype)


def spatial_fc(x, weight, bias, *, compute_dtype=jnp.bfloat16):
    """x: (B, N, D); weight: (N, N); bias: (N,). Returns (B, N, D)."""
    B, N, D = x.shape
    L = B * D  # fused lane width

    # Lane-fuse the batch: (B, N, D) -> (N, B, D) -> (N, B*D).
    x2 = jnp.transpose(x, (1, 0, 2)).reshape(N, L).astype(compute_dtype)
    w = weight.astype(compute_dtype)
    b2 = bias.astype(jnp.float32).reshape(N, 1)

    # Lane chunking: split the fused width into 128-aligned chunks so a v7x
    # megacore gets 2-way "parallel" work; otherwise a single full-width step.
    if L % 256 == 0:
        num_chunks = 2
        tl = L // 2          # multiple of 128 -> unmasked vst
    else:
        num_chunks = 1
        tl = L               # full extent (allowed even if < 128 at toy shapes)

    out2 = pl.pallas_call(
        spatial_fc_kernel,
        out_shape=jax.ShapeDtypeStruct((N, L), x.dtype),
        grid_spec=pltpu.PrefetchScalarGridSpec(
            num_scalar_prefetch=0,
            grid=(num_chunks,),
            in_specs=[
                pl.BlockSpec((N, tl), lambda g: (0, g)),  # x: one lane chunk per step
                pl.BlockSpec((N, N), lambda g: (0, 0)),   # weight: resident
                pl.BlockSpec((N, 1), lambda g: (0, 0)),   # bias: resident
            ],
            out_specs=pl.BlockSpec((N, tl), lambda g: (0, g)),
        ),
        compiler_params=pltpu.CompilerParams(
            dimension_semantics=("parallel",),
        ),
    )(x2, w, b2)

    # Un-fuse: (N, B*D) -> (N, B, D) -> (B, N, D).
    return jnp.transpose(out2.reshape(N, B, D), (1, 0, 2))


if __name__ == "__main__":
    # Small shapes consistent with the module: b=2, n(dim)=16, d=32
    B, N, D = 2, 16, 32

    key = jax.random.PRNGKey(0)
    kx, kw, kb = jax.random.split(key, 3)

    x = jax.random.normal(kx, (B, N, D), dtype=jnp.float32)

    # Deterministic param init mimicking nn.Linear(dim, dim): U(-1/sqrt(in), 1/sqrt(in))
    bound = 1.0 / (N ** 0.5)
    weight = jax.random.uniform(kw, (N, N), dtype=jnp.float32, minval=-bound, maxval=bound)
    bias = jax.random.uniform(kb, (N,), dtype=jnp.float32, minval=-bound, maxval=bound)

    out = spatial_fc(x, weight, bias)
    out = jax.block_until_ready(out)
    assert out.shape == (B, N, D)

    # Reference with the same bf16 input quantization (f32 accumulation),
    # matching the kernel's compute path.
    w_q = weight.astype(jnp.bfloat16).astype(jnp.float32)
    x_q = x.astype(jnp.bfloat16).astype(jnp.float32)
    ref_q = jnp.einsum("mn,bnd->bmd", w_q, x_q) + bias[None, :, None]
    assert jnp.allclose(out, ref_q, atol=1e-4, rtol=1e-4)

    # Coarse sanity check against the full-f32 math of the original module.
    ref_f32 = jnp.einsum("mn,bnd->bmd", weight, x) + bias[None, :, None]
    assert jnp.allclose(out, ref_f32, atol=5e-2, rtol=5e-2)

    print("KERNEL_OK")
</pallas_src>

<mosaic_0001>
module attributes {stable_mosaic.version = 11 : i64} {
  func.func @spatial_fc_kernel(%arg0: i32, %arg1: memref<16x64xbf16, #tpu.memory_space<vmem>>, %arg2: memref<16x16xbf16, #tpu.memory_space<vmem>>, %arg3: memref<16x1xf32, #tpu.memory_space<vmem>>, %arg4: memref<16x64xf32, #tpu.memory_space<vmem>>) attributes {dimension_semantics = [#tpu.dimension_semantics<parallel>], iteration_bounds = array<i64: 1>, scalar_prefetch = 0 : i64, scratch_operands = 0 : i64, tpu.core_type = #tpu.core_type<tc>, window_params = [{transform_indices = @transform_0, window_bounds = array<i64: 16, 64>}, {pipeline_mode = #tpu.pipeline_mode<synchronous>, transform_indices = @transform_1, window_bounds = array<i64: 16, 16>}, {pipeline_mode = #tpu.pipeline_mode<synchronous>, transform_indices = @transform_2, window_bounds = array<i64: 16, 1>}, {transform_indices = @transform_3, window_bounds = array<i64: 16, 64>}]} {
    %c0 = arith.constant 0 : index
    %c0_0 = arith.constant 0 : index
    %0 = vector.load %arg2[%c0, %c0_0] : memref<16x16xbf16, #tpu.memory_space<vmem>>, vector<16x16xbf16>
    %c0_1 = arith.constant 0 : index
    %c0_2 = arith.constant 0 : index
    %1 = vector.load %arg1[%c0_1, %c0_2] : memref<16x64xbf16, #tpu.memory_space<vmem>>, vector<16x64xbf16>
    %cst = arith.constant dense<0.000000e+00> : vector<16x64xf32>
    %2 = tpu.matmul %0, %1, %cst {dimension_numbers = #tpu.dot_dimension_numbers<[1], [0], [0], [1], [0, 0, 1, 1], [], []>} : vector<16x16xbf16>, vector<16x64xbf16>, vector<16x64xf32> -> vector<16x64xf32>
    %c0_3 = arith.constant 0 : index
    %c0_4 = arith.constant 0 : index
    %3 = vector.load %arg3[%c0_3, %c0_4] : memref<16x1xf32, #tpu.memory_space<vmem>>, vector<16x1xf32>
    %4 = vector.broadcast %3 : vector<16x1xf32> to vector<16x64xf32>
    %5 = arith.addf %2, %4 : vector<16x64xf32>
    %c0_5 = arith.constant 0 : index
    %c0_6 = arith.constant 0 : index
    %6 = vector.load %arg4[%c0_5, %c0_6] : memref<16x64xf32, #tpu.memory_space<vmem>>, vector<16x64xf32>
    tpu.vector_store %arg4[%c0_5, %c0_6], %5 {strides = array<i32>} : memref<16x64xf32, #tpu.memory_space<vmem>>, vector<16x64xf32>,
    return
  }
  func.func @transform_0(%arg0: i32) -> (i32, i32) {
    %c0_i32 = arith.constant 0 : i32
    %c0_i32_0 = arith.constant 0 : i32
    return %c0_i32, %arg0 : i32, i32
  }
  func.func @transform_1(%arg0: i32) -> (i32, i32) {
    %c0_i32 = arith.constant 0 : i32
    %c0_i32_0 = arith.constant 0 : i32
    %c0_i32_1 = arith.constant 0 : i32
    return %c0_i32, %c0_i32_0 : i32, i32
  }
  func.func @transform_2(%arg0: i32) -> (i32, i32) {
    %c0_i32 = arith.constant 0 : i32
    %c0_i32_0 = arith.constant 0 : i32
    %c0_i32_1 = arith.constant 0 : i32
    return %c0_i32, %c0_i32_0 : i32, i32
  }
  func.func @transform_3(%arg0: i32) -> (i32, i32) {
    %c0_i32 = arith.constant 0 : i32
    %c0_i32_0 = arith.constant 0 : i32
    return %c0_i32, %arg0 : i32, i32
  }
}

</mosaic_0001>

<bundles_post_ra>
// kernel: tpu_custom_call.1
= control target key start
LH: loop header
LB: loop body
LE: loop exit
PB: predicated region body
PF: predicated region fallthrough
CT: control target
= control target key end

     0   :  { %v151_v1 = vmov 0.0   ;;  %vm152_vm0 = vmmov 0   ;;  %vm43_vm1 = vcmask 130048   ;;  %s201_s0 = inlined_call_operand.vmem [shape: bf16[16,64], index: 0, kind: input, shape index: {}]   ;;  %s202_s1 = inlined_call_operand.vmem [shape: bf16[16,16], index: 1, kind: input, shape index: {}]   ;;  %s203_s2 = inlined_call_operand.vmem [shape: f32[16,1], index: 2, kind: input, shape index: {}]   ;;  %s204_s3 = inlined_call_operand.hbm [shape: f32[16,64], index: 3, kind: output, shape index: {}]  }
   0x1   :  { %v125_v0 = vld [vmem:[%s201_s0] sm:$0xff]   ;;  %112 = vmatprep.subr.bf16.mxu0 %v151_v1  ;;  %114 = vmatprep.mubr.msk.bf16.mxu0 %vm152_vm0, %v151_v1 }
   0x2   :  { %v126_v2 = vld [vmem:[%s202_s1] sm:$0xff]   ;;  %113 = vmatpush3.bf16.msra.mxu0 %v125_v0 }
   0x3   :  { %v20_v3 = vld [vmem:[%s203_s2] sm:$0xff] }
   0x4   :  { %8 = vsyncpa [#allocation3], 0  ;;  %v153_v4 = vmov 0   ;;  %v21_v5 = vld [vmem:[%s203_s2 + $0x8] sm:$0xff]  ;;  %s154_s1 = smov [#allocation2]   ;;  %vm88_vm2 = vcmask 523264  }
   0x5   :  { %124 = vset.pattern.permute.xlu0 %v153_v4  ;;  %115 = vmatmul.mubr.msk.bf16.vlgmr.msra.gmra.mrb[0].mxu0 %vm43_vm1, %v126_v2  ;;  %s96_s19 = sshll.u32 %s154_s1, 4  ;;  %s97_s19 = int_to_ptr.vmem [resolvable:$true] %s96_s19 }
   0x6   :  { %24 = vperm.xlu0 %124, %v20_v3   ;;  %s127_s20 = scalar_lea.vmem %s97_s19, 256  ;;  %p132_p1 = scmp.lt.s32.totalorder %s97_s19, %s97_s19 }
   0x7   :  { %p128_p0 = scmp.ne.s32.totalorder %s97_s19, %s127_s20  ;;  %p133_p2 = scmp.lt.s32.totalorder %s127_s20, %s127_s20 }
   0x9   :  { %p134_p3 = por %p133_p2, %p132_p1 }
   0xa   :  { %29 = vperm.xlu0 %124, %v21_v5  }
   0xb   :  { %p135_p4 = pnand %p134_p3, %p128_p0 }
  0x85   :  { %v25_v6 = vpop.permute.xlu0 %24 }
  0x89   :  { %v30_v10 = vpop.permute.xlu0 %29 }
  0xd8   :  { %v81_v7 = vpop.f32.mrb[0].mxu0 }
  0xd9   :  { %v82_v8 = vadd.f32 %v81_v7, %v25_v6  ;;  %v116_v9 = vpop.f32.mrb[1].mxu0 }
  0xda   :  { %v84_v11 = vpop.f32.mrb[2].mxu0 }
  0xdb   :  { %89 = vst.msk [vmem:[#allocation2] sm:$0xff] %vm88_vm2, %v82_v8  ;;  %v85_v12 = vadd.f32 %v84_v11, %v30_v10  ;;  %v117_v13 = vpop.f32.mrb[3].mxu0 }
  0xdd   :  { %90 = vst.msk [vmem:[#allocation2 + $0x8] sm:$0xff] %vm88_vm2, %v85_v12 }
  0xde   :  { %138 = shalt.err (!%p135_p4)
}
  0xdf   :  { %s139_s22 = scalar_lea.hbm %s204_s3, 256 }
  0xe0   :  { %p140_p5 = scmp.ne.s32.totalorder %s204_s3, %s139_s22  ;;  %p143_p6 = scmp.lt.u32.totalorder %s139_s22, %s204_s3 }
  0xe2   :  { %p145_p7 = pnand %p143_p6, %p140_p5 }
  0xe4   :  { %148 = shalt.err (!%p145_p7)
}
  0xe5   :  { %s155_s27 = smov 128   ;;  %s156_s28 = smov 8  }
  0xe6   :  { %102 = dma.vmem_to_hbm [thread:$0]  %s97_s19, 256, %s204_s3, [#allocation3], %s155_s27, %s155_s27, %s156_s28  }
  0xe7   :  { %149 = dma.done.wait [#allocation3], 256  }
  0xe8   :  { %150 = vsyncadd [#allocation3], 4294967040 }
  0xe9   :  { %106 = vsyncpa [#allocation3], 1 }

</bundles_post_ra>
